<compile_context>
chip_gen: v6e
topology: v6e:2x2x1
jax: 0.10.0
libtpu: 0.0.40
codegen_flags: <defaults>
</compile_context>

<pallas_src>
import numpy as np
import jax
import jax.numpy as jnp
from jax.experimental import pallas as pl
from jax.experimental.pallas import tpu as pltpu

N_QUBITS = 4
N_LAYERS = 2
N_CLASSES = 10
DIM = 2 ** N_QUBITS
LANE = 128


def _ceil_div(a, b):
    return -(-a // b)


def _round_up(a, m):
    return _ceil_div(a, m) * m


# ----------------------------------------------------------------------------
# Parameter-setup glue (plain numpy): build the fixed circuit unitary U, the
# folded observables A_i = Re(U^H Z_i U), the fully folded operator
# M = sum_i W[c,i] A_i flattened to (dim^2, n_cls_padded), and the constant
# selector / replication tables used by the kernel. Wire 0 is the MSB of the
# state index (PennyLane default.qubit convention).
# ----------------------------------------------------------------------------
def _kron_1q(gate, wire, n):
    ops = [np.eye(2, dtype=complex)] * n
    ops[wire] = gate
    out = ops[0]
    for o in ops[1:]:
        out = np.kron(out, o)
    return out


def _rx(t):
    c, s = np.cos(t / 2.0), np.sin(t / 2.0)
    return np.array([[c, -1j * s], [-1j * s, c]], dtype=complex)


def _ry(t):
    c, s = np.cos(t / 2.0), np.sin(t / 2.0)
    return np.array([[c, -s], [s, c]], dtype=complex)


def _rz(t):
    return np.array([[np.exp(-1j * t / 2.0), 0.0], [0.0, np.exp(1j * t / 2.0)]],
                    dtype=complex)


def _cnot(control, target, n):
    dim = 2 ** n
    U = np.zeros((dim, dim), dtype=complex)
    for k in range(dim):
        bits = [(k >> (n - 1 - q)) & 1 for q in range(n)]
        if bits[control] == 1:
            bits[target] ^= 1
        k2 = sum(b << (n - 1 - q) for q, b in enumerate(bits))
        U[k2, k] = 1.0
    return U


def build_circuit_matrices(params, n_qubits, n_layers):
    """Return (U, A): U full parameterized unitary, A = stacked Re(U^H Z_i U)."""
    n = n_qubits
    n_rot = n * 3
    n_ent = n * (n - 1) // 2
    U = np.eye(2 ** n, dtype=complex)
    for layer in range(n_layers):
        start = layer * (n_rot + n_ent)
        rot = params[start:start + n_rot]
        ent = params[start + n_rot:start + n_rot + n_ent]
        for i in range(n):
            U = _kron_1q(_rx(rot[i * 3 + 0]), i, n) @ U
            U = _kron_1q(_ry(rot[i * 3 + 1]), i, n) @ U
            U = _kron_1q(_rz(rot[i * 3 + 2]), i, n) @ U
        e = 0
        for i in range(n):
            for j in range(i + 1, n):
                U = _cnot(i, j, n) @ U
                U = _kron_1q(_rz(ent[e]), j, n) @ U
                e += 1
    Z = np.array([[1.0, 0.0], [0.0, -1.0]], dtype=complex)
    A = []
    for i in range(n):
        Zi = _kron_1q(Z, i, n)
        Oi = U.conj().T @ Zi @ U
        A.append(np.real(Oi))
    return U, np.stack(A).astype(np.float32)


def build_folded_operator(A, W, b, n_qubits):
    """Fold the Linear head into the observables and build constant tables.

    Returns:
      M        (dim^2, n_cls_pad) f32 : M[k*dim+l, c] = sum_i W[c,i] * A_i[k,l]
      b_pad    (1, n_cls_pad)     f32 : bias, zero-padded to the lane width
      psi_sel  (n_qubits, dim)    f32 : psi_sel[q, k] = bit q (MSB-first) of k
      R_rep    (dim, dim^2)       f32 : left[m]  = psi[m // dim]  replication
      R_tile   (dim, dim^2)       f32 : right[m] = psi[m %  dim]  replication
    """
    dim = 2 ** n_qubits
    n_cls = W.shape[0]
    n_cls_pad = ((n_cls + LANE - 1) // LANE) * LANE
    G = np.einsum('ci,ikl->klc', W.astype(np.float64), A.astype(np.float64))
    M = np.zeros((dim * dim, n_cls_pad), np.float32)
    M[:, :n_cls] = G.reshape(dim * dim, n_cls).astype(np.float32)
    b_pad = np.zeros((1, n_cls_pad), np.float32)
    b_pad[0, :n_cls] = np.asarray(b, np.float32)

    # psi selector rows (fused form: factor = c + sel*(s-c), no cos-half needed).
    k_idx = np.arange(dim)
    psi_sel = np.stack([((k_idx >> (n_qubits - 1 - q)) & 1).astype(np.float32)
                        for q in range(n_qubits)])                  # (n_q, dim)

    # Constant 0/1 replication matrices: expand psi (dim) -> the two dim^2-wide
    # rank-1 operands via MXU matmuls instead of full-width VALU selector chains.
    m_idx = np.arange(dim * dim)
    R_rep = (np.arange(dim)[:, None] == (m_idx // dim)[None, :]).astype(np.float32)
    R_tile = (np.arange(dim)[:, None] == (m_idx % dim)[None, :]).astype(np.float32)
    return M, b_pad, psi_sel, R_rep, R_tile


# ----------------------------------------------------------------------------
# Pallas kernel: trig encoding -> narrow psi chain -> MXU expansion -> one
# element-wise multiply -> single MXU matmul + bias.
# ----------------------------------------------------------------------------
def vqc_kernel(x_ref, psi_sel_ref, rrep_ref, rtile_ref, m_ref, b_ref, o_ref):
    tb, n_q = x_ref.shape
    dim = psi_sel_ref.shape[1]          # 16 for 4 qubits

    # RY(x*pi) encoding amplitudes (narrow (tb, n_q) slab, EUP/VPU).
    theta = x_ref[...] * jnp.float32(np.pi * 0.5)
    c = jnp.cos(theta)
    s = jnp.sin(theta)

    # psi[b,k] = prod_q (c_q + sel_q[k]*(s_q - c_q)) built on a dim(=16)-lane slab:
    # fused selector form, 1 broadcast-mul + 1 add (+1 psi mul) per qubit.
    psi = None
    for q in range(n_q):
        c_q = c[:, q:q + 1]                              # (tb, 1)
        d_q = s[:, q:q + 1] - c_q                        # (tb, 1)
        sel_q = psi_sel_ref[pl.ds(q, 1), :]              # (1, dim) constant 0/1 row
        f = c_q + sel_q * d_q                            # (tb, dim)
        psi = f if psi is None else psi * f

    # Expand psi to the two 256-wide rank-1 operands with constant replication
    # matmuls (MXU slot, exact since each row has a single 1), then one
    # element-wise multiply (single full-width VALU pass).
    left = jnp.dot(psi, rrep_ref[...], preferred_element_type=jnp.float32)    # psi[b, m//dim]
    right = jnp.dot(psi, rtile_ref[...], preferred_element_type=jnp.float32)  # psi[b, m%dim]
    phi = left * right                                                         # (tb, dim^2)

    # logits = phi @ M + b — one (tb, 256) x (256, 128) MXU matmul,
    # lane-dense (128-wide) output store.
    logits = jnp.dot(phi, m_ref[...], preferred_element_type=jnp.float32)
    o_ref[...] = logits + b_ref[...]


def make_vqc_forward(M, b_pad, psi_sel, R_rep, R_tile, n_classes, *, tile_b=2048):
    """Build a jitted forward(x) closure with all constants resident on device.

    x: (B, n_qubits) f32. Returns logits (B, n_classes) f32.
    """
    d2, n_cls_pad = M.shape
    n_q, dim = psi_sel.shape

    # Constants uploaded once (144 KiB total), not per call.
    psi_sel_d = jax.device_put(jnp.asarray(psi_sel, jnp.float32))
    rrep_d = jax.device_put(jnp.asarray(R_rep, jnp.float32))
    rtile_d = jax.device_put(jnp.asarray(R_tile, jnp.float32))
    m_d = jax.device_put(jnp.asarray(M, jnp.float32))
    b_d = jax.device_put(jnp.asarray(b_pad, jnp.float32))
    const_bytes = 4 * (psi_sel.size + R_rep.size + R_tile.size + M.size + b_pad.size)

    @jax.jit
    def forward(x):
        B, nq = x.shape
        # Balanced batch tiles: >=2 grid steps when possible (v7x dual-TC sharding),
        # padding waste capped at <8 rows, tile capped at tile_b (VMEM-safe on v7x).
        n_tiles = max(2, _ceil_div(B, tile_b))
        tb = min(tile_b, max(8, _round_up(_ceil_div(B, n_tiles), 8)))
        b_padded = _round_up(B, tb)
        nb = b_padded // tb

        x_p = jnp.pad(jnp.asarray(x, jnp.float32), ((0, b_padded - B), (0, 0)))

        out = pl.pallas_call(
            vqc_kernel,
            out_shape=jax.ShapeDtypeStruct((b_padded, n_cls_pad), jnp.float32),
            grid=(nb,),
            in_specs=[
                pl.BlockSpec((tb, nq), lambda i: (i, 0)),          # x: tiled over batch
                pl.BlockSpec((n_q, dim), lambda i: (0, 0)),        # psi selectors
                pl.BlockSpec((dim, d2), lambda i: (0, 0)),         # R_rep
                pl.BlockSpec((dim, d2), lambda i: (0, 0)),         # R_tile
                pl.BlockSpec((d2, n_cls_pad), lambda i: (0, 0)),   # folded operator
                pl.BlockSpec((1, n_cls_pad), lambda i: (0, 0)),    # bias
            ],
            out_specs=pl.BlockSpec((tb, n_cls_pad), lambda i: (i, 0)),
            compiler_params=pltpu.CompilerParams(
                dimension_semantics=("parallel",),
                vmem_limit_bytes=32 * 1024 * 1024),
            cost_estimate=pl.CostEstimate(
                flops=2 * b_padded * (d2 * n_cls_pad + 2 * dim * d2),
                transcendentals=2 * b_padded * nq,
                bytes_accessed=b_padded * 4 * (nq + n_cls_pad) + const_bytes),
        )(x_p, psi_sel_d, rrep_d, rtile_d, m_d, b_d)

        return out[:B, :n_classes]

    return forward


# ----------------------------------------------------------------------------
# Pure numpy reference: full complex statevector simulation per sample.
# ----------------------------------------------------------------------------
def reference_forward(x_np, U, W_np, b_np, n_qubits):
    B = x_np.shape[0]
    Z = np.array([[1.0, 0.0], [0.0, -1.0]], dtype=complex)
    quantum_out = np.zeros((B, n_qubits), dtype=np.float64)
    for bidx in range(B):
        psi = np.array([1.0 + 0j])
        for i in range(n_qubits):
            t = x_np[bidx, i] * np.pi
            psi = np.kron(psi, np.array([np.cos(t / 2.0), np.sin(t / 2.0)],
                                        dtype=complex))
        psi = U @ psi
        for i in range(n_qubits):
            Zi = _kron_1q(Z, i, n_qubits)
            quantum_out[bidx, i] = np.real(psi.conj() @ (Zi @ psi))
    return quantum_out @ W_np.T + b_np


if __name__ == "__main__":
    key = jax.random.PRNGKey(0)
    k_params, k_w, k_b, k_x, k_x2 = jax.random.split(key, 5)

    # Deterministic parameter init (shapes per VQCModel.__init__):
    n_params = (N_QUBITS * 3 + N_QUBITS * (N_QUBITS - 1) // 2) * N_LAYERS  # 36
    params = 0.1 * jax.random.normal(k_params, (n_params,), dtype=jnp.float32)
    bound = 1.0 / np.sqrt(N_QUBITS)
    W = jax.random.uniform(k_w, (N_CLASSES, N_QUBITS), jnp.float32, -bound, bound)
    b = jax.random.uniform(k_b, (N_CLASSES,), jnp.float32, -bound, bound)

    # Fold the data-independent circuit and the Linear head at setup time.
    U, A = build_circuit_matrices(np.asarray(params, dtype=np.float64),
                                  N_QUBITS, N_LAYERS)
    M, b_pad, psi_sel, R_rep, R_tile = build_folded_operator(
        A, np.asarray(W, np.float64), np.asarray(b, np.float64), N_QUBITS)

    forward = make_vqc_forward(M, b_pad, psi_sel, R_rep, R_tile, N_CLASSES)

    # Small example batch (module forward encodes the first n_qubits features).
    B = 8
    x = jax.random.uniform(k_x, (B, N_QUBITS), jnp.float32)
    logits = jax.block_until_ready(forward(x))
    ref = reference_forward(np.asarray(x, np.float64), U,
                            np.asarray(W, np.float64),
                            np.asarray(b, np.float64), N_QUBITS)
    np.testing.assert_allclose(np.asarray(logits), ref, rtol=1e-4, atol=1e-4)

    # Exercise the multi-tile grid path (balanced tiles + batch padding).
    B2 = 200
    x2 = jax.random.uniform(k_x2, (B2, N_QUBITS), jnp.float32)
    forward_small = make_vqc_forward(M, b_pad, psi_sel, R_rep, R_tile, N_CLASSES,
                                     tile_b=64)
    logits2 = jax.block_until_ready(forward_small(x2))
    ref2 = reference_forward(np.asarray(x2, np.float64), U,
                             np.asarray(W, np.float64),
                             np.asarray(b, np.float64), N_QUBITS)
    np.testing.assert_allclose(np.asarray(logits2), ref2, rtol=1e-4, atol=1e-4)

    print("KERNEL_OK")
</pallas_src>

<mosaic_0001>
module attributes {stable_mosaic.version = 11 : i64} {
  func.func @vqc_kernel(%arg0: i32, %arg1: memref<8x4xf32, #tpu.memory_space<vmem>>, %arg2: memref<4x16xf32, #tpu.memory_space<vmem>>, %arg3: memref<16x256xf32, #tpu.memory_space<vmem>>, %arg4: memref<16x256xf32, #tpu.memory_space<vmem>>, %arg5: memref<256x128xf32, #tpu.memory_space<vmem>>, %arg6: memref<1x128xf32, #tpu.memory_space<vmem>>, %arg7: memref<8x128xf32, #tpu.memory_space<vmem>>) attributes {dimension_semantics = [#tpu.dimension_semantics<parallel>], iteration_bounds = array<i64: 1>, scalar_prefetch = 0 : i64, scratch_operands = 0 : i64, tpu.core_type = #tpu.core_type<tc>, window_params = [{transform_indices = @transform_0, window_bounds = array<i64: 8, 4>}, {pipeline_mode = #tpu.pipeline_mode<synchronous>, transform_indices = @transform_1, window_bounds = array<i64: 4, 16>}, {pipeline_mode = #tpu.pipeline_mode<synchronous>, transform_indices = @transform_2, window_bounds = array<i64: 16, 256>}, {pipeline_mode = #tpu.pipeline_mode<synchronous>, transform_indices = @transform_3, window_bounds = array<i64: 16, 256>}, {pipeline_mode = #tpu.pipeline_mode<synchronous>, transform_indices = @transform_4, window_bounds = array<i64: 256, 128>}, {pipeline_mode = #tpu.pipeline_mode<synchronous>, transform_indices = @transform_5, window_bounds = array<i64: 1, 128>}, {transform_indices = @transform_6, window_bounds = array<i64: 8, 128>}]} {
    %c0 = arith.constant 0 : index
    %c0_0 = arith.constant 0 : index
    %0 = vector.load %arg1[%c0, %c0_0] : memref<8x4xf32, #tpu.memory_space<vmem>>, vector<8x4xf32>
    %cst = arith.constant 1.57079637 : f32
    %1 = vector.broadcast %cst : f32 to vector<8x4xf32>
    %2 = arith.mulf %0, %1 : vector<8x4xf32>
    %3 = math.cos %2 : vector<8x4xf32>
    %4 = math.sin %2 : vector<8x4xf32>
    %5 = vector.extract_strided_slice %3 {offsets = [0, 0], sizes = [8, 1], strides = [1, 1]} : vector<8x4xf32> to vector<8x1xf32>
    %6 = vector.extract_strided_slice %4 {offsets = [0, 0], sizes = [8, 1], strides = [1, 1]} : vector<8x4xf32> to vector<8x1xf32>
    %7 = arith.subf %6, %5 : vector<8x1xf32>
    %c0_1 = arith.constant 0 : index
    %c0_2 = arith.constant 0 : index
    %8 = vector.load %arg2[%c0_1, %c0_2] : memref<4x16xf32, #tpu.memory_space<vmem>>, vector<1x16xf32>
    %9 = vector.broadcast %8 : vector<1x16xf32> to vector<8x16xf32>
    %10 = vector.broadcast %7 : vector<8x1xf32> to vector<8x16xf32>
    %11 = arith.mulf %9, %10 : vector<8x16xf32>
    %12 = vector.broadcast %5 : vector<8x1xf32> to vector<8x16xf32>
    %13 = arith.addf %12, %11 : vector<8x16xf32>
    %14 = vector.extract_strided_slice %3 {offsets = [0, 1], sizes = [8, 1], strides = [1, 1]} : vector<8x4xf32> to vector<8x1xf32>
    %15 = vector.extract_strided_slice %4 {offsets = [0, 1], sizes = [8, 1], strides = [1, 1]} : vector<8x4xf32> to vector<8x1xf32>
    %16 = arith.subf %15, %14 : vector<8x1xf32>
    %c1 = arith.constant 1 : index
    %c0_3 = arith.constant 0 : index
    %17 = vector.load %arg2[%c1, %c0_3] : memref<4x16xf32, #tpu.memory_space<vmem>>, vector<1x16xf32>
    %18 = vector.broadcast %17 : vector<1x16xf32> to vector<8x16xf32>
    %19 = vector.broadcast %16 : vector<8x1xf32> to vector<8x16xf32>
    %20 = arith.mulf %18, %19 : vector<8x16xf32>
    %21 = vector.broadcast %14 : vector<8x1xf32> to vector<8x16xf32>
    %22 = arith.addf %21, %20 : vector<8x16xf32>
    %23 = arith.mulf %13, %22 : vector<8x16xf32>
    %24 = vector.extract_strided_slice %3 {offsets = [0, 2], sizes = [8, 1], strides = [1, 1]} : vector<8x4xf32> to vector<8x1xf32>
    %25 = vector.extract_strided_slice %4 {offsets = [0, 2], sizes = [8, 1], strides = [1, 1]} : vector<8x4xf32> to vector<8x1xf32>
    %26 = arith.subf %25, %24 : vector<8x1xf32>
    %c2 = arith.constant 2 : index
    %c0_4 = arith.constant 0 : index
    %27 = vector.load %arg2[%c2, %c0_4] : memref<4x16xf32, #tpu.memory_space<vmem>>, vector<1x16xf32>
    %28 = vector.broadcast %27 : vector<1x16xf32> to vector<8x16xf32>
    %29 = vector.broadcast %26 : vector<8x1xf32> to vector<8x16xf32>
    %30 = arith.mulf %28, %29 : vector<8x16xf32>
    %31 = vector.broadcast %24 : vector<8x1xf32> to vector<8x16xf32>
    %32 = arith.addf %31, %30 : vector<8x16xf32>
    %33 = arith.mulf %23, %32 : vector<8x16xf32>
    %34 = vector.extract_strided_slice %3 {offsets = [0, 3], sizes = [8, 1], strides = [1, 1]} : vector<8x4xf32> to vector<8x1xf32>
    %35 = vector.extract_strided_slice %4 {offsets = [0, 3], sizes = [8, 1], strides = [1, 1]} : vector<8x4xf32> to vector<8x1xf32>
    %36 = arith.subf %35, %34 : vector<8x1xf32>
    %c3 = arith.constant 3 : index
    %c0_5 = arith.constant 0 : index
    %37 = vector.load %arg2[%c3, %c0_5] : memref<4x16xf32, #tpu.memory_space<vmem>>, vector<1x16xf32>
    %38 = vector.broadcast %37 : vector<1x16xf32> to vector<8x16xf32>
    %39 = vector.broadcast %36 : vector<8x1xf32> to vector<8x16xf32>
    %40 = arith.mulf %38, %39 : vector<8x16xf32>
    %41 = vector.broadcast %34 : vector<8x1xf32> to vector<8x16xf32>
    %42 = arith.addf %41, %40 : vector<8x16xf32>
    %43 = arith.mulf %33, %42 : vector<8x16xf32>
    %c0_6 = arith.constant 0 : index
    %c0_7 = arith.constant 0 : index
    %44 = vector.load %arg3[%c0_6, %c0_7] : memref<16x256xf32, #tpu.memory_space<vmem>>, vector<16x256xf32>
    %cst_8 = arith.constant dense<0.000000e+00> : vector<8x256xf32>
    %45 = tpu.matmul %43, %44, %cst_8 {dimension_numbers = #tpu.dot_dimension_numbers<[1], [0], [0], [1], [0, 0, 1, 1], [], []>} : vector<8x16xf32>, vector<16x256xf32>, vector<8x256xf32> -> vector<8x256xf32>
    %c0_9 = arith.constant 0 : index
    %c0_10 = arith.constant 0 : index
    %46 = vector.load %arg4[%c0_9, %c0_10] : memref<16x256xf32, #tpu.memory_space<vmem>>, vector<16x256xf32>
    %cst_11 = arith.constant dense<0.000000e+00> : vector<8x256xf32>
    %47 = tpu.matmul %43, %46, %cst_11 {dimension_numbers = #tpu.dot_dimension_numbers<[1], [0], [0], [1], [0, 0, 1, 1], [], []>} : vector<8x16xf32>, vector<16x256xf32>, vector<8x256xf32> -> vector<8x256xf32>
    %48 = arith.mulf %45, %47 : vector<8x256xf32>
    %c0_12 = arith.constant 0 : index
    %c0_13 = arith.constant 0 : index
    %49 = vector.load %arg5[%c0_12, %c0_13] : memref<256x128xf32, #tpu.memory_space<vmem>>, vector<256x128xf32>
    %cst_14 = arith.constant dense<0.000000e+00> : vector<8x128xf32>
    %50 = tpu.matmul %48, %49, %cst_14 {dimension_numbers = #tpu.dot_dimension_numbers<[1], [0], [0], [1], [0, 0, 1, 1], [], []>} : vector<8x256xf32>, vector<256x128xf32>, vector<8x128xf32> -> vector<8x128xf32>
    %c0_15 = arith.constant 0 : index
    %c0_16 = arith.constant 0 : index
    %51 = vector.load %arg6[%c0_15, %c0_16] : memref<1x128xf32, #tpu.memory_space<vmem>>, vector<1x128xf32>
    %52 = vector.broadcast %51 : vector<1x128xf32> to vector<8x128xf32>
    %53 = arith.addf %50, %52 : vector<8x128xf32>
    %c0_17 = arith.constant 0 : index
    %c0_18 = arith.constant 0 : index
    %54 = vector.load %arg7[%c0_17, %c0_18] : memref<8x128xf32, #tpu.memory_space<vmem>>, vector<8x128xf32>
    tpu.vector_store %arg7[%c0_17, %c0_18], %53 {strides = array<i32>} : memref<8x128xf32, #tpu.memory_space<vmem>>, vector<8x128xf32>,
    return
  }
  func.func @transform_0(%arg0: i32) -> (i32, i32) {
    %c0_i32 = arith.constant 0 : i32
    %c0_i32_0 = arith.constant 0 : i32
    return %arg0, %c0_i32 : i32, i32
  }
  func.func @transform_1(%arg0: i32) -> (i32, i32) {
    %c0_i32 = arith.constant 0 : i32
    %c0_i32_0 = arith.constant 0 : i32
    %c0_i32_1 = arith.constant 0 : i32
    return %c0_i32, %c0_i32_0 : i32, i32
  }
  func.func @transform_2(%arg0: i32) -> (i32, i32) {
    %c0_i32 = arith.constant 0 : i32
    %c0_i32_0 = arith.constant 0 : i32
    %c0_i32_1 = arith.constant 0 : i32
    return %c0_i32, %c0_i32_0 : i32, i32
  }
  func.func @transform_3(%arg0: i32) -> (i32, i32) {
    %c0_i32 = arith.constant 0 : i32
    %c0_i32_0 = arith.constant 0 : i32
    %c0_i32_1 = arith.constant 0 : i32
    return %c0_i32, %c0_i32_0 : i32, i32
  }
  func.func @transform_4(%arg0: i32) -> (i32, i32) {
    %c0_i32 = arith.constant 0 : i32
    %c0_i32_0 = arith.constant 0 : i32
    %c0_i32_1 = arith.constant 0 : i32
    return %c0_i32, %c0_i32_0 : i32, i32
  }
  func.func @transform_5(%arg0: i32) -> (i32, i32) {
    %c0_i32 = arith.constant 0 : i32
    %c0_i32_0 = arith.constant 0 : i32
    %c0_i32_1 = arith.constant 0 : i32
    return %c0_i32, %c0_i32_0 : i32, i32
  }
  func.func @transform_6(%arg0: i32) -> (i32, i32) {
    %c0_i32 = arith.constant 0 : i32
    %c0_i32_0 = arith.constant 0 : i32
    return %arg0, %c0_i32 : i32, i32
  }
}

</mosaic_0001>

<bundles_post_ra>
// kernel: forward.1
= control target key start
LH: loop header
LB: loop body
LE: loop exit
PB: predicated region body
PF: predicated region fallthrough
CT: control target
= control target key end

     0   :  { %11 = vsyncpa [#allocation3], 0  ;;  %s900_s0 = inlined_call_operand.vmem [shape: f32[8,4], index: 0, kind: input, shape index: {}]   ;;  %s901_s1 = inlined_call_operand.vmem [shape: f32[4,16], index: 1, kind: input, shape index: {}]   ;;  %s902_s2 = inlined_call_operand.hbm [shape: f32[16,256], index: 2, kind: input, shape index: {}]   ;;  %s903_s3 = inlined_call_operand.hbm [shape: f32[16,256], index: 3, kind: input, shape index: {}]   ;;  %s904_s4 = inlined_call_operand.hbm [shape: f32[256,128], index: 4, kind: input, shape index: {}]   ;;  %s905_s5 = inlined_call_operand.vmem [shape: f32[1,128], index: 5, kind: input, shape index: {}]   ;;  %s906_s6 = inlined_call_operand.hbm [shape: f32[8,128], index: 6, kind: output, shape index: {}]  }
   0x1   :  { %12 = vsyncpa [#allocation6], 0 }
   0x2   :  { %13 = vsyncpa [#allocation4], 0  ;;  %s793_s21 = smov [#allocation5]   ;;  %s794_s23 = smov [#allocation2]  }
   0x3   :  { %s35_s22 = sshll.u32 %s793_s21, 4  ;;  %s23_s24 = sshll.u32 %s794_s23, 4  ;;  %s36_s22 = int_to_ptr.vmem [resolvable:$true] %s35_s22  ;;  %s24_s24 = int_to_ptr.vmem [resolvable:$true] %s23_s24 }
   0x4   :  { %s715_s25 = scalar_lea.vmem %s36_s22, 512  ;;  %p720_p1 = scmp.lt.s32.totalorder %s36_s22, %s36_s22 }
   0x5   :  { %p716_p0 = scmp.ne.s32.totalorder %s36_s22, %s715_s25  ;;  %p721_p2 = scmp.lt.s32.totalorder %s715_s25, %s715_s25 }
   0x7   :  { %p722_p3 = por %p721_p2, %p720_p1 }
   0x9   :  { %p723_p4 = pnand %p722_p3, %p716_p0 }
   0xb   :  { %726 = shalt.err (!%p723_p4)
}
   0xc   :  { %s795_s26 = smov 256   ;;  %s796_s27 = smov 16  }
   0xd   :  { %41 = dma.hbm_to_vmem [thread:$0]  %s903_s3, 512, %s36_s22, [#allocation6], %s795_s26, %s795_s26, %s796_s27  }
   0xe   :  { %s735_s30 = scalar_lea.vmem %s24_s24, 512  ;;  %p740_p6 = scmp.lt.s32.totalorder %s24_s24, %s24_s24 }
   0xf   :  { %p736_p5 = scmp.ne.s32.totalorder %s24_s24, %s735_s30  ;;  %p741_p7 = scmp.lt.s32.totalorder %s735_s30, %s735_s30 }
  0x11   :  { %p742_p8 = por %p741_p7, %p740_p6 }
  0x13   :  { %p743_p9 = pnand %p742_p8, %p736_p5 }
  0x15   :  { %746 = shalt.err (!%p743_p9)
}
  0x16   :  { %29 = dma.hbm_to_vmem [thread:$0]  %s902_s2, 512, %s24_s24, [#allocation3], %s795_s26, %s795_s26, %s796_s27  }
  0x17   :  { %s797_s9 = smov [#allocation7]  }
  0x18   :  { %s47_s10 = sshll.u32 %s797_s9, 4  ;;  %s48_s10 = int_to_ptr.vmem [resolvable:$true] %s47_s10 }
  0x19   :  { %s755_s11 = scalar_lea.vmem %s48_s10, 4096  ;;  %p760_p11 = scmp.lt.s32.totalorder %s48_s10, %s48_s10 }
  0x1a   :  { %p756_p10 = scmp.ne.s32.totalorder %s48_s10, %s755_s11  ;;  %p761_p12 = scmp.lt.s32.totalorder %s755_s11, %s755_s11 }
  0x1c   :  { %p762_p13 = por %p761_p12, %p760_p11 }
  0x1e   :  { %p763_p0 = pnand %p762_p13, %p756_p10 }
  0x20   :  { %766 = shalt.err (!%p763_p0)
}
  0x21   :  { %s798_s3 = smov 128   ;;  %s799_s12 = smov 8  }
  0x22   :  { %53 = dma.hbm_to_vmem [thread:$0]  %s904_s4, 4096, %s48_s10, [#allocation6], %s798_s3, %s798_s3, %s799_s12  }
  0x23   :  { %787 = dma.done.wait [#allocation3], 512  }
  0x24   :  { %788 = vsyncadd [#allocation3], 4294966784 }
  0x25   :  { %789 = dma.done.wait [#allocation6], 4608  }
  0x26   :  { %790 = vsyncadd [#allocation6], 4294962688  ;;  %v800_v0 = vmov 0   ;;  %v65_v1 = vld [vmem:[%s900_s0] sm:$0xff]  ;;  %v801_v14 = vmov 683565275  }
  0x27   :  { %695 = vset.pattern.permute.xlu1 %v800_v0  ;;  %697 = vset.pattern.permute.xlu0 %v800_v0  ;;  %v859_v2 = vmul.f32 1.5707964, %v65_v1  ;;  %v802_v16 = vmov 2475754826   ;;  %v803_v18 = vmov 2131351028  }
  0x28   :  { %v804_v20 = vmov 2102212464   ;;  %v805_v22 = vmov 920167782   ;;  %v806_v29 = vmov 1326507024  }
  0x29   :  { %v70_v3 = vand.u32 2139095040, %v859_v2  ;;  %v67_v5 = vand.u32 2147483647, %v859_v2  ;;  %vm69_vm7 = vcmp.lt.s32.totalorder %v859_v2, 0  ;;  %vm159_vm15 = vweird.f32 %v859_v2  ;;  %s811_s23 = smov [#allocation8]  }
  0x2a   :  { %s612_s24 = sshll.u32 %s811_s23, 4  ;;  %s613_s24 = int_to_ptr.vmem [resolvable:$true] %s612_s24 }
  0x2b   :  { %v71_v4 = vshrl.u32 %v70_v3, 23  ;;  %v74_v8 = vand.u32 8388607, %v67_v5  ;;  %vm68_vm8 = vcmp.le.f32.partialorder %v67_v5, 0.7853982  ;;  %s767_s25 = scalar_lea.vmem %s613_s24, 128  ;;  %p772_p2 = scmp.lt.s32.totalorder %s613_s24, %s613_s24 }
  0x2c   :  { %p768_p1 = scmp.ne.s32.totalorder %s613_s24, %s767_s25  ;;  %p773_p3 = scmp.lt.s32.totalorder %s767_s25, %s767_s25 }
  0x2d   :  { %v622_v6 = vadd.s32 4294967169, %v71_v4  ;;  %v75_v11 = vor.u32 8388608, %v74_v8 }
  0x2e   :  { %p774_p4 = por %p773_p3, %p772_p2 }
  0x2f   :  { %v77_v7 = vadd.s32 1, %v622_v6  ;;  %v115_v31 = vshll.u32 %v75_v11, 8 }
  0x30   :  { %p775_p5 = pnand %p774_p4, %p768_p1 }
  0x31   :  { %vm78_vm0 = vcmp.gt.s32.totalorder %v77_v7, 0 }
  0x32   :  { %v79_v9 = vsel %vm78_vm0, %v77_v7, 0  ;;  %vm344_vm0 = vcmask 130048  }
  0x33   :  { %v81_v10 = vand.u32 31, %v79_v9  ;;  %v80_v12 = vshrl.u32 %v79_v9, 5 }
  0x35   :  { %v82_v13 = vsub.s32 32, %v81_v10  ;;  %v84_v15 = vshll.u32 %v801_v14, %v81_v10  ;;  %v87_v17 = vshll.u32 %v802_v16, %v81_v10  ;;  %v90_v19 = vshll.u32 %v803_v18, %v81_v10 }
  0x36   :  { %v93_v21 = vshll.u32 %v804_v20, %v81_v10  ;;  %v96_v23 = vshll.u32 %v805_v22, %v81_v10  ;;  %vm99_vm1 = vcmp.lt.s32.totalorder %v80_v12, 1  ;;  %vm102_vm2 = vcmp.lt.s32.totalorder %v80_v12, 4 }
  0x37   :  { %v83_v24 = vshrl.u32 %v801_v14, %v82_v13  ;;  %v85_v25 = vshrl.u32 %v802_v16, %v82_v13  ;;  %v88_v26 = vshrl.u32 %v803_v18, %v82_v13  ;;  %v91_v27 = vshrl.u32 %v804_v20, %v82_v13 }
  0x38   :  { %v94_v28 = vshrl.u32 %v805_v22, %v82_v13  ;;  %v97_v30 = vshrl.u32 %v806_v29, %v82_v13  ;;  %vm100_vm3 = vcmp.lt.s32.totalorder %v80_v12, 2  ;;  %vm101_vm4 = vcmp.lt.s32.totalorder %v80_v12, 3 }
  0x39   :  { %v86_v32 = vor.u32 %v85_v25, %v84_v15  ;;  %v89_v33 = vor.u32 %v88_v26, %v87_v17  ;;  %v92_v34 = vor.u32 %v91_v27, %v90_v19 }
  0x3a   :  { %v95_v35 = vor.u32 %v94_v28, %v93_v21  ;;  %v98_v36 = vor.u32 %v97_v30, %v96_v23 }
  0x3b   :  { %v103_v37 = vsel %vm99_vm1, %v83_v24, %v86_v32  ;;  %v104_v38 = vsel %vm102_vm2, %v92_v34, 2102212464  ;;  %v107_v39 = vsel %vm99_vm1, %v86_v32, %v89_v33  ;;  %v111_v40 = vsel %vm99_vm1, %v89_v33, %v92_v34 }
  0x3c   :  { %v105_v41 = vsel %vm101_vm4, %v89_v33, %v104_v38  ;;  %v108_v42 = vsel %vm102_vm2, %v95_v35, 920167782  ;;  %v112_v43 = vsel %vm102_vm2, %v98_v36, 1326507024  ;;  %v808_v38 = vmov 2  }
  0x3d   :  { %v109_v44 = vsel %vm101_vm4, %v92_v34, %v108_v42  ;;  %v113_v45 = vsel %vm101_vm4, %v95_v35, %v112_v43  ;;  %v106_v46 = vsel %vm100_vm3, %v103_v37, %v105_v41  ;;  %v807_v37 = vmov 1   ;;  %v341_v41 = vld [vmem:[#allocation2 + $0x8] sm:$0xff]  ;;  %v340_v42 = vld [vmem:[#allocation2] sm:$0xff]  ;;  %v422_v43 = vld [vmem:[#allocation5 + $0x18] sm:$0xff] }
  0x3e   :  { %v110_v47 = vsel %vm100_vm3, %v107_v39, %v109_v44  ;;  %v114_v48 = vsel %vm100_vm3, %v111_v40, %v113_v45  ;;  %v122_v53 = vmul.u32 %v115_v31, %v106_v46  ;;  %v809_v39 = vmov 3   ;;  %v342_v40 = vld [vmem:[#allocation2 + $0x10] sm:$0xff]  ;;  %v527_v45 = vld [vmem:[#allocation7 + $0xf8] sm:$0xff] }
  0x3f   :  { %v865_v49 = vmul.u32.u64.low %v115_v31, %v114_v48  ;;  %v866_v50 = vmul.u32.u64.high %v115_v31, %v114_v48, %v865_v49  ;;  %v868_v51 = vmul.u32.u64.low %v115_v31, %v110_v47  ;;  %v869_v52 = vmul.u32.u64.high %v115_v31, %v110_v47, %v868_v51  ;;  %v511_v46 = vld [vmem:[#allocation7 + $0x78] sm:$0xff]  ;;  %v526_v47 = vld [vmem:[#allocation7 + $0xf0] sm:$0xff]  ;;  %637 = vmatprep.subr.mxu0 %v527_v45 }
  0x40   :  { %v810_v44 = vmov 0.0   ;;  %v510_v48 = vld [vmem:[#allocation7 + $0x70] sm:$0xff]  ;;  %638 = vmatpush3.msra.mxu0 %v511_v46  ;;  %v525_v49 = vld [vmem:[#allocation7 + $0xe8] sm:$0xff]  ;;  %v636_v46 = vld [vmem:[%s905_s5] ss:$0 sm:$0xff] }
  0x41   :  { %vm124_vm5 = vc.u32 %v866_v50, %v868_v51  ;;  %v125_v54 = vadd.s32 1, %v869_v52  ;;  %v123_v1 = vadd.s32 %v868_v51, %v866_v50  ;;  %412 = vmatprep.mubr.f32.mxu1 %v810_v44  ;;  %639 = vmatprep.subr.mxu0 %v526_v47  ;;  %v509_v50 = vld [vmem:[#allocation7 + $0x68] sm:$0xff]  ;;  %v524_v51 = vld [vmem:[#allocation7 + $0xe0] sm:$0xff] }
  0x42   :  { %640 = vmatpush3.msra.mxu0 %v510_v48 }
  0x43   :  { %v126_v55 = vsel %vm124_vm5, %v125_v54, %v869_v52  ;;  %641 = vmatprep.subr.mxu0 %v525_v49  ;;  %v508_v52 = vld [vmem:[#allocation7 + $0x60] sm:$0xff]  ;;  %v507_v54 = vld [vmem:[#allocation7 + $0x58] sm:$0xff] }
  0x44   :  { %v127_v56 = vadd.s32 %v126_v55, %v122_v53  ;;  %642 = vmatpush3.msra.mxu0 %v509_v50  ;;  %v523_v53 = vld [vmem:[#allocation7 + $0xd8] sm:$0xff]  ;;  %v522_v55 = vld [vmem:[#allocation7 + $0xd0] sm:$0xff] }
  0x45   :  { %643 = vmatprep.subr.mxu0 %v524_v51 }
  0x46   :  { %v128_v57 = vadd.s32 536870912, %v127_v56  ;;  %644 = vmatpush3.msra.mxu0 %v508_v52 }
  0x47   :  { %645 = vmatprep.subr.mxu0 %v523_v53 }
  0x48   :  { %v129_v58 = vshrl.u32 %v128_v57, 30  ;;  %646 = vmatpush3.msra.mxu0 %v507_v54  ;;  %v521_v57 = vld [vmem:[#allocation7 + $0xc8] sm:$0xff] }
  0x49   :  { %647 = vmatprep.subr.mxu0 %v522_v55 }
  0x4a   :  { %v130_v59 = vshll.u32 %v129_v58, 30  ;;  %v153_v16 = vsub.s32 4, %v129_v58 }
  0x4c   :  { %v131_v60 = vsub.s32 %v127_v56, %v130_v59  ;;  %v154_v19 = vsel %vm69_vm7, %v153_v16, %v129_v58  ;;  %v506_v56 = vld [vmem:[#allocation7 + $0x50] sm:$0xff]  ;;  %v505_v58 = vld [vmem:[#allocation7 + $0x48] sm:$0xff]  ;;  %v520_v59 = vld [vmem:[#allocation7 + $0xc0] sm:$0xff] }
  0x4d   :  { %v156_v21 = vsel %vm68_vm8, 0, %v154_v19  ;;  %648 = vmatpush3.msra.mxu0 %v506_v56  ;;  %v633_v19 = vld [vmem:[%s901_s1 + $0x3] ss:$0 sm:$0xff] }
  0x4e   :  { %v133_v61 = vsub.s32 0, %v131_v60  ;;  %v263_v22 = vadd.s32 3, %v156_v21  ;;  %v160_v23 = vand.u32 3, %v156_v21  ;;  %649 = vmatprep.subr.mxu0 %v521_v57 }
  0x4f   :  { %650 = vmatpush3.msra.mxu0 %v505_v58 }
  0x50   :  { %v623_v62 = vmin.u32 %v133_v61, %v131_v60  ;;  %v264_v24 = vand.u32 3, %v263_v22  ;;  %vm165_vm9 = vcmp.eq.s32.totalorder %v160_v23, 2  ;;  %vm162_vm11 = vcmp.eq.s32.totalorder %v160_v23, 0  ;;  %v519_v61 = vld [vmem:[#allocation7 + $0xb8] sm:$0xff]  ;;  %651 = vmatprep.subr.mxu0 %v520_v59 }
  0x51   :  { %vm161_vm13 = vcmp.lt.s32.totalorder %v160_v23, 2 }
  0x52   :  { %v135_v63 = vclz %v623_v62  ;;  %vm269_vm10 = vcmp.eq.s32.totalorder %v264_v24, 2  ;;  %vm266_vm12 = vcmp.eq.s32.totalorder %v264_v24, 0  ;;  %vm265_vm14 = vcmp.lt.s32.totalorder %v264_v24, 2  ;;  %v503_v62 = vld [vmem:[#allocation7 + $0x38] sm:$0xff] }
  0x54   :  { %v624_v0 = vadd.s32 4294967294, %v135_v63  ;;  %v518_v63 = vld [vmem:[#allocation7 + $0xb0] sm:$0xff] }
  0x56   :  { %vm625_vm6 = vcmp.lt.s32.totalorder %v624_v0, 0 }
  0x57   :  { %v138_v3 = vsel %vm625_vm6, 0, %v624_v0  ;;  %v502_v0 = vld [vmem:[#allocation7 + $0x30] sm:$0xff] }
  0x58   :  { %v139_v4 = vsub.s32 32, %v138_v3  ;;  %v140_v6 = vshll.u32 %v131_v60, %v138_v3  ;;  %v143_v7 = vsub.s32 4294967266, %v138_v3  ;;  %v504_v60 = vld [vmem:[#allocation7 + $0x40] sm:$0xff]  ;;  %v501_v3 = vld [vmem:[#allocation7 + $0x28] sm:$0xff] }
  0x59   :  { %652 = vmatpush3.msra.mxu0 %v504_v60 }
  0x5a   :  { %v141_v8 = vshrl.u32 %v123_v1, %v139_v4  ;;  %v144_v9 = vadd.s32 127, %v143_v7  ;;  %653 = vmatprep.subr.mxu0 %v519_v61  ;;  %v517_v1 = vld [vmem:[#allocation7 + $0xa8] sm:$0xff] }
  0x5b   :  { %654 = vmatpush3.msra.mxu0 %v503_v62 }
  0x5c   :  { %v142_v10 = vor.u32 %v141_v8, %v140_v6  ;;  %v145_v11 = vshll.u32 %v144_v9, 23  ;;  %655 = vmatprep.subr.mxu0 %v518_v63  ;;  %v631_v8 = vld [vmem:[%s901_s1 + $0x1] ss:$0 sm:$0xff]  ;;  %v630_v9 = vld [vmem:[%s901_s1] ss:$0 sm:$0xff] }
  0x5d   :  { %656 = vmatpush3.msra.mxu0 %v502_v0 }
  0x5e   :  { %v146_v12 = vor.u32 4788187, %v145_v11  ;;  %v149_v13 = vcvt.s32.f32 %v142_v10  ;;  %657 = vmatprep.subr.mxu0 %v517_v1 }
  0x5f   :  { %658 = vmatpush3.msra.mxu0 %v501_v3 }
  0x60   :  { %v147_v14 = vand.u32 2147483647, %v146_v12  ;;  %v632_v12 = vld [vmem:[%s901_s1 + $0x2] ss:$0 sm:$0xff] }
  0x62   :  { %v150_v15 = vmul.f32 %v149_v13, %v147_v14 }
  0x64   :  { %v151_v17 = vxor.u32 2147483648, %v150_v15 }
  0x66   :  { %v152_v18 = vsel %vm69_vm7, %v151_v17, %v150_v15 }
  0x67   :  { %v155_v20 = vsel %vm68_vm8, %v859_v2, %v152_v18  ;;  %v343_v2 = vld [vmem:[#allocation2 + $0x18] sm:$0xff] }
  0x68   :  { %703 = vcosq.f32 %v155_v20  ;;  %376 = vmatprep.subr.mxu1 %v343_v2  ;;  %v496_v2 = vld [vmem:[#allocation7] sm:$0xff] }
  0x69   :  { %705 = vsinq.f32 %v155_v20  ;;  %377 = vmatpush1.msra.mxu1 %v342_v40 }
  0x6a   :  { %378 = vmatprep.subr.mxu1 %v341_v41 }
  0x6b   :  { %379 = vmatpush1.msra.mxu1 %v340_v42 }
  0x6c   :  { %451 = vmatprep.subr.mxu1 %v422_v43 }
  0x75   :  { %v704_v25 = vpop.eup %703 }
  0x76   :  { %v706_v26 = vpop.eup %705  ;;  %v166_v27 = vxor.u32 2147483648, %v704_v25 }
  0x77   :  { %v163_v5 = vxor.u32 2147483648, %v706_v26 }
  0x78   :  { %v167_v28 = vsel %vm165_vm9, %v166_v27, %v706_v26  ;;  %v271_v29 = vsel %vm269_vm10, %v166_v27, %v706_v26 }
  0x79   :  { %v164_v30 = vsel %vm162_vm11, %v704_v25, %v163_v5  ;;  %v268_v31 = vsel %vm266_vm12, %v704_v25, %v163_v5  ;;  %v421_v5 = vld [vmem:[#allocation5 + $0x10] sm:$0xff] }
  0x7a   :  { %v168_v32 = vsel %vm161_vm13, %v164_v30, %v167_v28  ;;  %v272_v33 = vsel %vm265_vm14, %v268_v31, %v271_v29  ;;  %v420_v28 = vld [vmem:[#allocation5 + $0x8] sm:$0xff]  ;;  %v419_v29 = vld [vmem:[#allocation5] sm:$0xff] }
  0x7b   :  { %v169_v34 = vsel %vm159_vm15, nan, %v168_v32  ;;  %v273_v35 = vsel %vm159_vm15, nan, %v272_v33  ;;  %v516_v30 = vld [vmem:[#allocation7 + $0xa0] sm:$0xff]  ;;  %v515_v32 = vld [vmem:[#allocation7 + $0x98] sm:$0xff] }
  0x7c   :  { %288 = vperm.xlu1 %695, %v169_v34   ;;  %v274_v36 = vsub.f32 %v273_v35, %v169_v34  ;;  %659 = vmatprep.subr.mxu0 %v516_v30  ;;  %v500_v31 = vld [vmem:[#allocation7 + $0x20] sm:$0xff]  ;;  %v499_v33 = vld [vmem:[#allocation7 + $0x18] sm:$0xff]  ;;  %v498_v35 = vld [vmem:[#allocation7 + $0x10] sm:$0xff] }
  0x7d   :  { %660 = vmatpush3.msra.mxu0 %v500_v31 }
  0x7e   :  { %282 = vperm.xlu0 %697, %v274_v36   ;;  %661 = vmatprep.subr.mxu0 %v515_v32 }
  0x7f   :  { %662 = vmatpush3.msra.mxu0 %v499_v33 }
  0x80   :  { %696 = vset.pattern.permute.xlu1 %v807_v37 }
  0x81   :  { %303 = vperm.xlu1 %696, %v169_v34  }
  0x82   :  { %698 = vset.pattern.permute.xlu0 %v807_v37  ;;  %v497_v37 = vld [vmem:[#allocation7 + $0x8] sm:$0xff] }
  0x83   :  { %298 = vperm.xlu0 %698, %v274_v36  }
  0x85   :  { %699 = vset.pattern.permute.xlu1 %v808_v38 }
  0x86   :  { %314 = vperm.xlu1 %699, %v274_v36  }
  0x87   :  { %700 = vset.pattern.permute.xlu0 %v808_v38  ;;  %v512_v38 = vld [vmem:[#allocation7 + $0x80] sm:$0xff] }
  0x88   :  { %319 = vperm.xlu0 %700, %v169_v34  }
  0x8a   :  { %701 = vset.pattern.permute.xlu1 %v809_v39 }
  0x8b   :  { %330 = vperm.xlu1 %701, %v274_v36   ;;  %v513_v36 = vld [vmem:[#allocation7 + $0x88] sm:$0xff] }
  0x8c   :  { %702 = vset.pattern.permute.xlu0 %v809_v39 }
  0x8f   :  { %335 = vperm.xlu1 %701, %v169_v34   ;;  %v514_v34 = vld [vmem:[#allocation7 + $0x90] sm:$0xff] }
  0x90   :  { %663 = vmatprep.subr.mxu0 %v514_v34 }
  0x91   :  { %664 = vmatpush3.msra.mxu0 %v498_v35 }
  0x92   :  { %665 = vmatprep.subr.mxu0 %v513_v36 }
  0x93   :  { %666 = vmatpush3.msra.mxu0 %v497_v37 }
  0x94   :  { %667 = vmatprep.subr.mxu0 %v512_v38 }
  0x95   :  { %668 = vmatpush3.msra.mxu0 %v496_v2 }
  0xf7   :  { %v289_v4 = vpop.permute.xlu1 %288 }
  0xf9   :  { %v283_v6 = vpop.permute.xlu0 %282 }
  0xfa   :  { %v285_v13 = vmul.f32 %v630_v9, %v283_v6 }
  0xfc   :  { %v304_v7 = vpop.permute.xlu1 %303  ;;  %v291_v18 = vadd.f32 %v289_v4, %v285_v13 }
  0xfe   :  { %v299_v10 = vpop.permute.xlu0 %298 }
  0xff   :  { %v301_v11 = vmul.f32 %v631_v8, %v299_v10 }
 0x101   :  { %v315_v14 = vpop.permute.xlu1 %314  ;;  %v306_v15 = vadd.f32 %v304_v7, %v301_v11 }
 0x102   :  { %v317_v16 = vmul.f32 %v632_v12, %v315_v14 }
 0x103   :  { %v320_v17 = vpop.permute.xlu0 %319  ;;  %v307_v21 = vmul.f32 %v306_v15, %v291_v18 }
 0x104   :  { %v322_v22 = vadd.f32 %v320_v17, %v317_v16 }
 0x106   :  { %v331_v20 = vpop.permute.xlu1 %330  ;;  %v323_v25 = vmul.f32 %v322_v22, %v307_v21 }
 0x107   :  { %v333_v23 = vmul.f32 %v633_v19, %v331_v20 }
 0x10a   :  { %v336_v24 = vpop.permute.xlu1 %335 }
 0x10b   :  { %v338_v26 = vadd.f32 %v336_v24, %v333_v23 }
 0x10d   :  { %v339_v27 = vmul.f32 %v338_v26, %v323_v25 }
 0x10f   :  { %634 = vmatmul.mubr.msk.f32.vlgmr.msra.gmra.mxu1 %vm344_vm0, %v339_v27 }
 0x110   :  { %452 = vmatpush1.msra.mxu1 %v421_v5  ;;  %487 = vmatprep.mubr.f32.mxu1 %v810_v44 }
 0x111   :  { %453 = vmatprep.subr.mxu1 %v420_v28 }
 0x112   :  { %454 = vmatpush1.msra.mxu1 %v419_v29 }
 0x113   :  { %635 = vmatmul.mubr.msk.f32.vlgmr.msra.gmra.mxu1 %vm344_vm0, %v339_v27 }
 0x1cf   :  { %v414_v39 = vpop.f32.mrf.mxu1 }
 0x1d1   :  { %v416_v40 = vpop.f32.mrf.mxu1 }
 0x1d3   :  { %v489_v41 = vpop.f32.mrf.mxu1 }
 0x1d4   :  { %v494_v44 = vmul.f32 %v489_v41, %v414_v39 }
 0x1d5   :  { %v491_v42 = vpop.f32.mrf.mxu1 }
 0x1d6   :  { %v495_v43 = vmul.f32 %v491_v42, %v416_v40 }
 0x1d8   :  { %599 = vmatprep.mubr.f32.mxu0 %v495_v43 }
 0x1d9   :  { %600 = vmatmul.mubr.f32.vlgmr.msra.gmra.mxu0 %v494_v44 }
 0x299   :  { %v669_v45 = vpop.f32.mrf.mxu0 }
 0x29b   :  { %v670_v47 = vpop.f32.mrf.mxu0 }
 0x29c   :  { %v671_v48 = vadd.f32 %v670_v47, %v669_v45 }
 0x29e   :  { %v602_v49 = vadd.f32 %v671_v48, %v636_v46 }
 0x2a0   :  { %605 = vst [vmem:[#allocation8] sm:$0xff] %v602_v49 }
 0x2a1   :  { %778 = shalt.err (!%p775_p5)
}
 0x2a2   :  { %615 = dma.vmem_to_hbm [thread:$0]  %s613_s24, 128, %s906_s6, [#allocation4]  }
 0x2a3   :  { %791 = dma.done.wait [#allocation4], 128  }
 0x2a4   :  { %792 = vsyncadd [#allocation4], 4294967168 }
 0x2a5   :  { %619 = vsyncpa [#allocation3], 1 }
 0x2a6   :  { %620 = vsyncpa [#allocation6], 1 }
 0x2a7   :  { %621 = vsyncpa [#allocation4], 1 }

</bundles_post_ra>
